<compile_context>
chip_gen: v6e
topology: v6e:2x2x1
jax: 0.10.0
libtpu: 0.0.40
codegen_flags: <defaults>
</compile_context>

<pallas_src>
import functools

import jax
import jax.numpy as jnp
from jax.experimental import pallas as pl
from jax.experimental.pallas import tpu as pltpu

_P = 128  # lane width; every feature dim (x_dim, h_dim, z_dim) is padded to one block


def _vae_kernel(data_ref, w_ref, b_ref, out_ref, *, num_mc, batch, x_dim, z_dim):
    f32 = jnp.float32
    bf16 = jnp.bfloat16
    P = _P
    B = batch

    def dense(h, col, width=P):
        # bf16 MXU operands, f32 accumulation, f32 bias add (elementwise stays f32).
        wv = w_ref[:, col:col + width]                     # (P, width) bf16
        bv = b_ref[:, col:col + width]                     # (1, width) f32
        return jnp.dot(h.astype(bf16), wv, preferred_element_type=f32) + bv

    x = data_ref[0:B, :]                                   # (B, P) f32; lanes >= x_dim are 0
    eps = data_ref[B:(1 + num_mc) * B, :]                  # (num_mc*B, P) f32; lanes >= z_dim are 0

    # ---- inference network: inf -> fused (mean | std) head, blocks lane-aligned ----
    h = jnp.maximum(dense(x, 0 * P), 0.0)
    h = jnp.maximum(dense(h, 1 * P), 0.0)
    head = dense(h, 2 * P, 2 * P)                          # (B, 2P): [mean block | std block]
    z_mean = jax.nn.sigmoid(head[:, :P])                   # (B, P); pad lanes = 0.5 (masked below)
    z_std = jax.nn.softplus(head[:, P:])                   # (B, P); pad lanes = log 2 (masked below)

    # ---- KLD vs N(0, I) (std-based formula), masked to the real z lanes ----
    lane_z = jax.lax.broadcasted_iota(jnp.int32, (B, P), 1)
    kld_el = -2.0 * jnp.log(z_std) + z_std * z_std + z_mean * z_mean - 1.0
    kld = 0.5 * jnp.sum(jnp.where(lane_z < z_dim, kld_el, 0.0),
                        axis=(0, 1), keepdims=True)        # (1, 1)

    # ---- MC-batched decoder: all num_mc draws through one matmul set ----
    eps3 = eps.reshape(num_mc, B, P)
    z_all3 = eps3 * z_std[None] + z_mean[None]             # reshape-broadcast, no jnp.tile
    z_all = z_all3.reshape(num_mc * B, P)
    hg = jnp.maximum(dense(z_all, 4 * P), 0.0)
    hg = jnp.maximum(dense(hg, 5 * P), 0.0)
    pre = dense(hg, 6 * P)                                  # (num_mc*B, P) logits; pad lanes 0
    # gen_std branch (x_std) is dead code in the reference forward -> omitted.

    # ---- Bernoulli NLL, BCE-with-logits form: sum[ softplus(pre) - x*pre ] / num_mc ----
    lane_x = jax.lax.broadcasted_iota(jnp.int32, pre.shape, 1)
    sp_sum = jnp.sum(jnp.where(lane_x < x_dim, jax.nn.softplus(pre), 0.0),
                     axis=(0, 1), keepdims=True)
    pre3 = pre.reshape(num_mc, B, P)
    x_term = jnp.sum(x * jnp.sum(pre3, axis=0),             # MC-reduce first, then one multiply
                     axis=(0, 1), keepdims=True)            # x pad lanes are 0 -> auto-masked
    nll = (sp_sum - x_term) * f32(1.0 / num_mc)
    neg_elbo = kld + nll

    # ---- last-draw tensors + packed scalars -> one lane-dense output slab ----
    out_ref[0:B, :] = z_all3[num_mc - 1]                    # rows 0:B   : z_sample (last draw)
    out_ref[B:2 * B, :] = jax.nn.sigmoid(pre3[num_mc - 1])  # rows B:2B  : x_mean   (last draw)
    lane_s = jax.lax.broadcasted_iota(jnp.int32, (8, P), 1)
    out_ref[2 * B:2 * B + 8, :] = jnp.where(                # rows 2B:2B+8: [neg_elbo, kld, nll, 0...]
        lane_s == 0, neg_elbo,
        jnp.where(lane_s == 1, kld,
                  jnp.where(lane_s == 2, nll, 0.0)))


def _pad2(a, rows, cols):
    out = jnp.zeros((rows, cols), a.dtype)
    return out.at[:a.shape[0], :a.shape[1]].set(a)


def vae_forward(x, eps, params, *, num_mc):
    """x: (B, x_dim) f32, eps: (num_mc, B, z_dim) f32, params: dict of weights."""
    B, x_dim = x.shape
    _, _, z_dim = eps.shape
    h_dim = params["w_i1"].shape[1]
    P = _P
    assert B % 8 == 0, "keep B a multiple of 8 (f32 sublane height) or pad"
    assert max(x_dim, z_dim, h_dim) <= P, "feature dims must fit one 128-lane block"

    # --- 3 input slabs instead of 14 tiny arrays (fewer HBM->VMEM DMAs) ---
    data = jnp.concatenate(
        [_pad2(x.astype(jnp.float32), B, P),
         _pad2(eps.reshape(num_mc * B, z_dim).astype(jnp.float32), num_mc * B, P)],
        axis=0)                                                     # ((1+num_mc)*B, P) f32

    w_names = ["w_i1", "w_i2", "w_im", "w_is", "w_g1", "w_g2", "w_gm"]
    b_names = ["b_i1", "b_i2", "b_im", "b_is", "b_g1", "b_g2", "b_gm"]
    w_slab = jnp.concatenate([_pad2(params[k], P, P) for k in w_names],
                             axis=1).astype(jnp.bfloat16)           # (P, 7P) bf16
    b_slab = jnp.concatenate([_pad2(params[k], 1, P) for k in b_names],
                             axis=1).astype(jnp.float32)            # (1, 7P) f32
    # w_gs / b_gs intentionally NOT packed: dead code in the reference forward.

    vmem = pl.BlockSpec(memory_space=pltpu.MemorySpace.VMEM)
    # TODO(synk): for production shapes (large B, x_dim~784, h_dim~400) add a
    # batch-parallel grid (BlockSpec tiling over B, dimension_semantics=("parallel",),
    # per-tile kld/nll partials reduced in the wrapper) so v7x's two TensorCores are
    # used and per-step VMEM stays under its 64 MiB; at these toy sizes a single
    # invocation is optimal.
    out = pl.pallas_call(
        functools.partial(_vae_kernel, num_mc=num_mc, batch=B,
                          x_dim=x_dim, z_dim=z_dim),
        out_shape=jax.ShapeDtypeStruct((2 * B + 8, P), jnp.float32),
        in_specs=[vmem, vmem, vmem],
        out_specs=vmem,
    )(data, w_slab, b_slab)

    z_sample = out[:B, :z_dim]
    x_mean = out[B:2 * B, :x_dim]
    neg_elbo = out[2 * B, 0]
    kld = out[2 * B, 1]
    nll = out[2 * B, 2]
    return z_sample, x_mean, neg_elbo, kld, nll


def vae_forward_ref(x, eps, params, *, num_mc):
    """Pure-JAX f32 reference mirroring the PyTorch forward (for validation)."""
    def lin(h, w, b):
        return h @ w + b
    h = jax.nn.relu(lin(x, params["w_i1"], params["b_i1"]))
    h = jax.nn.relu(lin(h, params["w_i2"], params["b_i2"]))
    z_mean = jax.nn.sigmoid(lin(h, params["w_im"], params["b_im"]))
    z_std = jax.nn.softplus(lin(h, params["w_is"], params["b_is"]))
    kld = 0.5 * jnp.sum(-2.0 * jnp.log(z_std) + z_std ** 2 + z_mean ** 2 - 1.0)
    nll = 0.0
    for i in range(num_mc):
        z_sample = eps[i] * z_std + z_mean
        hg = jax.nn.relu(lin(z_sample, params["w_g1"], params["b_g1"]))
        hg = jax.nn.relu(lin(hg, params["w_g2"], params["b_g2"]))
        x_mean = jax.nn.sigmoid(lin(hg, params["w_gm"], params["b_gm"]))
        nll = nll + (-jnp.sum(x * jnp.log(x_mean) + (1.0 - x) * jnp.log(1.0 - x_mean)))
    nll = nll / (1.0 * num_mc)
    return z_sample, x_mean, kld + nll, kld, nll


def init_params(key, x_dim, z_dim, h_dim):
    """Deterministic PyTorch-Linear-style init: U(-1/sqrt(fan_in), 1/sqrt(fan_in))."""
    def lin(k, fan_in, fan_out):
        k1, k2 = jax.random.split(k)
        bound = 1.0 / jnp.sqrt(jnp.float32(fan_in))
        w = jax.random.uniform(k1, (fan_in, fan_out), jnp.float32, -bound, bound)
        b = jax.random.uniform(k2, (1, fan_out), jnp.float32, -bound, bound)
        return w, b

    keys = jax.random.split(key, 8)
    p = {}
    p["w_i1"], p["b_i1"] = lin(keys[0], x_dim, h_dim)   # inf.0
    p["w_i2"], p["b_i2"] = lin(keys[1], h_dim, h_dim)   # inf.2
    p["w_im"], p["b_im"] = lin(keys[2], h_dim, z_dim)   # inf_mean
    p["w_is"], p["b_is"] = lin(keys[3], h_dim, z_dim)   # inf_std
    p["w_g1"], p["b_g1"] = lin(keys[4], z_dim, h_dim)   # gen.0
    p["w_g2"], p["b_g2"] = lin(keys[5], h_dim, h_dim)   # gen.2
    p["w_gm"], p["b_gm"] = lin(keys[6], h_dim, x_dim)   # gen_mean
    p["w_gs"], p["b_gs"] = lin(keys[7], h_dim, x_dim)   # gen_std (unused by forward)
    return p


if __name__ == "__main__":
    B, X_DIM, Z_DIM, H_DIM, NUM_MC = 8, 16, 8, 32, 3

    key = jax.random.PRNGKey(0)
    k_params, k_x, k_eps = jax.random.split(key, 3)

    params = init_params(k_params, X_DIM, Z_DIM, H_DIM)
    # Bernoulli-like data in (0, 1) so the reference log terms stay finite.
    x = jax.random.uniform(k_x, (B, X_DIM), jnp.float32, 0.05, 0.95)
    eps = jax.random.normal(k_eps, (NUM_MC, B, Z_DIM), jnp.float32)

    fwd = jax.jit(functools.partial(vae_forward, num_mc=NUM_MC))
    z_sample, x_mean, neg_elbo, kld, nll = fwd(x, eps, params)
    jax.block_until_ready((z_sample, x_mean, neg_elbo, kld, nll))

    assert z_sample.shape == (B, Z_DIM)
    assert x_mean.shape == (B, X_DIM)
    assert neg_elbo.shape == () and kld.shape == () and nll.shape == ()
    assert bool(jnp.isfinite(neg_elbo)) and bool(jnp.isfinite(kld)) and bool(jnp.isfinite(nll))

    # Numerical cross-check against a pure-JAX f32 mirror of the torch forward.
    # Tolerances reflect bf16 MXU operands in the kernel (f32 accumulation).
    z_r, xm_r, ne_r, kld_r, nll_r = vae_forward_ref(x, eps, params, num_mc=NUM_MC)
    assert jnp.allclose(z_sample, z_r, rtol=2e-2, atol=2e-2)
    assert jnp.allclose(x_mean, xm_r, rtol=2e-2, atol=2e-2)
    assert jnp.allclose(neg_elbo, ne_r, rtol=2e-2, atol=0.5)
    assert jnp.allclose(kld, kld_r, rtol=2e-2, atol=0.5)
    assert jnp.allclose(nll, nll_r, rtol=2e-2, atol=0.5)

    print("KERNEL_OK")
</pallas_src>

<mosaic_0001>
module attributes {stable_mosaic.version = 11 : i64} {
  func.func @_vae_kernel(%arg0: memref<32x128xf32, #tpu.memory_space<vmem>>, %arg1: memref<128x896xbf16, #tpu.memory_space<vmem>>, %arg2: memref<1x896xf32, #tpu.memory_space<vmem>>, %arg3: memref<24x128xf32, #tpu.memory_space<vmem>>) attributes {dimension_semantics = [], scalar_prefetch = 0 : i64, scratch_operands = 0 : i64, tpu.core_type = #tpu.core_type<tc>} {
    %c0 = arith.constant 0 : index
    %c0_0 = arith.constant 0 : index
    %0 = vector.load %arg0[%c0, %c0_0] : memref<32x128xf32, #tpu.memory_space<vmem>>, vector<8x128xf32>
    %c8 = arith.constant 8 : index
    %c0_1 = arith.constant 0 : index
    %1 = vector.load %arg0[%c8, %c0_1] : memref<32x128xf32, #tpu.memory_space<vmem>>, vector<24x128xf32>
    %c0_2 = arith.constant 0 : index
    %c0_3 = arith.constant 0 : index
    %2 = vector.load %arg1[%c0_2, %c0_3] : memref<128x896xbf16, #tpu.memory_space<vmem>>, vector<128x128xbf16>
    %c0_4 = arith.constant 0 : index
    %c0_5 = arith.constant 0 : index
    %3 = vector.load %arg2[%c0_4, %c0_5] : memref<1x896xf32, #tpu.memory_space<vmem>>, vector<1x128xf32>
    %4 = arith.truncf %0 : vector<8x128xf32> to vector<8x128xbf16>
    %cst = arith.constant dense<0.000000e+00> : vector<8x128xf32>
    %5 = tpu.matmul %4, %2, %cst {dimension_numbers = #tpu.dot_dimension_numbers<[1], [0], [0], [1], [0, 0, 1, 1], [], []>} : vector<8x128xbf16>, vector<128x128xbf16>, vector<8x128xf32> -> vector<8x128xf32>
    %6 = vector.broadcast %3 : vector<1x128xf32> to vector<8x128xf32>
    %7 = arith.addf %5, %6 : vector<8x128xf32>
    %cst_6 = arith.constant 0.000000e+00 : f32
    %8 = vector.broadcast %cst_6 : f32 to vector<8x128xf32>
    %9 = arith.maximumf %7, %8 : vector<8x128xf32>
    %c0_7 = arith.constant 0 : index
    %c128 = arith.constant 128 : index
    %10 = vector.load %arg1[%c0_7, %c128] : memref<128x896xbf16, #tpu.memory_space<vmem>>, vector<128x128xbf16>
    %c0_8 = arith.constant 0 : index
    %c128_9 = arith.constant 128 : index
    %11 = vector.load %arg2[%c0_8, %c128_9] : memref<1x896xf32, #tpu.memory_space<vmem>>, vector<1x128xf32>
    %12 = arith.truncf %9 : vector<8x128xf32> to vector<8x128xbf16>
    %cst_10 = arith.constant dense<0.000000e+00> : vector<8x128xf32>
    %13 = tpu.matmul %12, %10, %cst_10 {dimension_numbers = #tpu.dot_dimension_numbers<[1], [0], [0], [1], [0, 0, 1, 1], [], []>} : vector<8x128xbf16>, vector<128x128xbf16>, vector<8x128xf32> -> vector<8x128xf32>
    %14 = vector.broadcast %11 : vector<1x128xf32> to vector<8x128xf32>
    %15 = arith.addf %13, %14 : vector<8x128xf32>
    %cst_11 = arith.constant 0.000000e+00 : f32
    %16 = vector.broadcast %cst_11 : f32 to vector<8x128xf32>
    %17 = arith.maximumf %15, %16 : vector<8x128xf32>
    %c0_12 = arith.constant 0 : index
    %c256 = arith.constant 256 : index
    %18 = vector.load %arg1[%c0_12, %c256] : memref<128x896xbf16, #tpu.memory_space<vmem>>, vector<128x256xbf16>
    %c0_13 = arith.constant 0 : index
    %c256_14 = arith.constant 256 : index
    %19 = vector.load %arg2[%c0_13, %c256_14] : memref<1x896xf32, #tpu.memory_space<vmem>>, vector<1x256xf32>
    %20 = arith.truncf %17 : vector<8x128xf32> to vector<8x128xbf16>
    %cst_15 = arith.constant dense<0.000000e+00> : vector<8x256xf32>
    %21 = tpu.matmul %20, %18, %cst_15 {dimension_numbers = #tpu.dot_dimension_numbers<[1], [0], [0], [1], [0, 0, 1, 1], [], []>} : vector<8x128xbf16>, vector<128x256xbf16>, vector<8x256xf32> -> vector<8x256xf32>
    %22 = vector.broadcast %19 : vector<1x256xf32> to vector<8x256xf32>
    %23 = arith.addf %21, %22 : vector<8x256xf32>
    %24 = vector.extract_strided_slice %23 {offsets = [0, 0], sizes = [8, 128], strides = [1, 1]} : vector<8x256xf32> to vector<8x128xf32>
    %25 = arith.negf %24 : vector<8x128xf32>
    %26 = math.exp %25 : vector<8x128xf32>
    %cst_16 = arith.constant 1.000000e+00 : f32
    %27 = vector.broadcast %cst_16 : f32 to vector<8x128xf32>
    %28 = arith.addf %27, %26 : vector<8x128xf32>
    %29 = arith.divf %27, %28 : vector<8x128xf32>
    %30 = vector.extract_strided_slice %23 {offsets = [0, 128], sizes = [8, 128], strides = [1, 1]} : vector<8x256xf32> to vector<8x128xf32>
    %cst_17 = arith.constant 0.000000e+00 : f32
    %31 = vector.broadcast %cst_17 : f32 to vector<8x128xf32>
    %32 = arith.maximumf %30, %31 : vector<8x128xf32>
    %33 = vector.broadcast %cst_17 : f32 to vector<8x128xf32>
    %34 = arith.subf %30, %33 : vector<8x128xf32>
    %35 = arith.cmpf one, %34, %34 : vector<8x128xf32>
    %36 = vector.broadcast %cst_17 : f32 to vector<8x128xf32>
    %37 = arith.addf %30, %36 : vector<8x128xf32>
    %38 = math.absf %34 : vector<8x128xf32>
    %cst_18 = arith.constant 0.000000e+00 : f32
    %39 = vector.broadcast %cst_18 : f32 to vector<8x128xf32>
    %40 = arith.subf %39, %38 : vector<8x128xf32>
    %41 = math.exp %40 : vector<8x128xf32>
    %42 = math.log1p %41 : vector<8x128xf32>
    %43 = arith.addf %32, %42 : vector<8x128xf32>
    %44 = arith.select %35, %37, %43 : vector<8x128xi1>, vector<8x128xf32>
    %45 = tpu.iota {dimensions = array<i32: 1>} : vector<8x128xi32>
    %46 = math.log %44 : vector<8x128xf32>
    %cst_19 = arith.constant -2.000000e+00 : f32
    %47 = vector.broadcast %cst_19 : f32 to vector<8x128xf32>
    %48 = arith.mulf %47, %46 : vector<8x128xf32>
    %49 = arith.mulf %44, %44 : vector<8x128xf32>
    %50 = arith.addf %48, %49 : vector<8x128xf32>
    %51 = arith.mulf %29, %29 : vector<8x128xf32>
    %52 = arith.addf %50, %51 : vector<8x128xf32>
    %cst_20 = arith.constant 1.000000e+00 : f32
    %53 = vector.broadcast %cst_20 : f32 to vector<8x128xf32>
    %54 = arith.subf %52, %53 : vector<8x128xf32>
    %c8_i32 = arith.constant 8 : i32
    %55 = vector.broadcast %c8_i32 : i32 to vector<8x128xi32>
    %56 = arith.cmpi slt, %45, %55 : vector<8x128xi32>
    %cst_21 = arith.constant 0.000000e+00 : f32
    %57 = vector.broadcast %cst_21 : f32 to vector<8x128xf32>
    %58 = arith.select %56, %54, %57 : vector<8x128xi1>, vector<8x128xf32>
    %59 = vector.shape_cast %58 : vector<8x128xf32> to vector<1x8x128xf32>
    %cst_22 = arith.constant dense<0.000000e+00> : vector<1xf32>
    %60 = vector.multi_reduction <add>, %59, %cst_22 [1, 2] : vector<1x8x128xf32> to vector<1xf32>
    %61 = vector.shape_cast %60 : vector<1xf32> to vector<1x1x1xf32>
    %62 = vector.extract %61[0, 0, 0] : f32 from vector<1x1x1xf32>
    %63 = vector.broadcast %62 : f32 to vector<1x1xf32>
    %cst_23 = arith.constant 5.000000e-01 : f32
    %64 = vector.broadcast %cst_23 : f32 to vector<1x1xf32>
    %65 = arith.mulf %64, %63 : vector<1x1xf32>
    %66 = vector.shape_cast %1 : vector<24x128xf32> to vector<3x8x128xf32>
    %67 = vector.shape_cast %44 : vector<8x128xf32> to vector<1x8x128xf32>
    %68 = vector.broadcast %67 : vector<1x8x128xf32> to vector<3x8x128xf32>
    %69 = arith.mulf %66, %68 : vector<3x8x128xf32>
    %70 = vector.shape_cast %29 : vector<8x128xf32> to vector<1x8x128xf32>
    %71 = vector.broadcast %70 : vector<1x8x128xf32> to vector<3x8x128xf32>
    %72 = arith.addf %69, %71 : vector<3x8x128xf32>
    %73 = vector.shape_cast %72 : vector<3x8x128xf32> to vector<24x128xf32>
    %c0_24 = arith.constant 0 : index
    %c512 = arith.constant 512 : index
    %74 = vector.load %arg1[%c0_24, %c512] : memref<128x896xbf16, #tpu.memory_space<vmem>>, vector<128x128xbf16>
    %c0_25 = arith.constant 0 : index
    %c512_26 = arith.constant 512 : index
    %75 = vector.load %arg2[%c0_25, %c512_26] : memref<1x896xf32, #tpu.memory_space<vmem>>, vector<1x128xf32>
    %76 = arith.truncf %73 : vector<24x128xf32> to vector<24x128xbf16>
    %cst_27 = arith.constant dense<0.000000e+00> : vector<24x128xf32>
    %77 = tpu.matmul %76, %74, %cst_27 {dimension_numbers = #tpu.dot_dimension_numbers<[1], [0], [0], [1], [0, 0, 1, 1], [], []>} : vector<24x128xbf16>, vector<128x128xbf16>, vector<24x128xf32> -> vector<24x128xf32>
    %78 = vector.broadcast %75 : vector<1x128xf32> to vector<24x128xf32>
    %79 = arith.addf %77, %78 : vector<24x128xf32>
    %cst_28 = arith.constant 0.000000e+00 : f32
    %80 = vector.broadcast %cst_28 : f32 to vector<24x128xf32>
    %81 = arith.maximumf %79, %80 : vector<24x128xf32>
    %c0_29 = arith.constant 0 : index
    %c640 = arith.constant 640 : index
    %82 = vector.load %arg1[%c0_29, %c640] : memref<128x896xbf16, #tpu.memory_space<vmem>>, vector<128x128xbf16>
    %c0_30 = arith.constant 0 : index
    %c640_31 = arith.constant 640 : index
    %83 = vector.load %arg2[%c0_30, %c640_31] : memref<1x896xf32, #tpu.memory_space<vmem>>, vector<1x128xf32>
    %84 = arith.truncf %81 : vector<24x128xf32> to vector<24x128xbf16>
    %cst_32 = arith.constant dense<0.000000e+00> : vector<24x128xf32>
    %85 = tpu.matmul %84, %82, %cst_32 {dimension_numbers = #tpu.dot_dimension_numbers<[1], [0], [0], [1], [0, 0, 1, 1], [], []>} : vector<24x128xbf16>, vector<128x128xbf16>, vector<24x128xf32> -> vector<24x128xf32>
    %86 = vector.broadcast %83 : vector<1x128xf32> to vector<24x128xf32>
    %87 = arith.addf %85, %86 : vector<24x128xf32>
    %cst_33 = arith.constant 0.000000e+00 : f32
    %88 = vector.broadcast %cst_33 : f32 to vector<24x128xf32>
    %89 = arith.maximumf %87, %88 : vector<24x128xf32>
    %c0_34 = arith.constant 0 : index
    %c768 = arith.constant 768 : index
    %90 = vector.load %arg1[%c0_34, %c768] : memref<128x896xbf16, #tpu.memory_space<vmem>>, vector<128x128xbf16>
    %c0_35 = arith.constant 0 : index
    %c768_36 = arith.constant 768 : index
    %91 = vector.load %arg2[%c0_35, %c768_36] : memref<1x896xf32, #tpu.memory_space<vmem>>, vector<1x128xf32>
    %92 = arith.truncf %89 : vector<24x128xf32> to vector<24x128xbf16>
    %cst_37 = arith.constant dense<0.000000e+00> : vector<24x128xf32>
    %93 = tpu.matmul %92, %90, %cst_37 {dimension_numbers = #tpu.dot_dimension_numbers<[1], [0], [0], [1], [0, 0, 1, 1], [], []>} : vector<24x128xbf16>, vector<128x128xbf16>, vector<24x128xf32> -> vector<24x128xf32>
    %94 = vector.broadcast %91 : vector<1x128xf32> to vector<24x128xf32>
    %95 = arith.addf %93, %94 : vector<24x128xf32>
    %96 = tpu.iota {dimensions = array<i32: 1>} : vector<24x128xi32>
    %c16_i32 = arith.constant 16 : i32
    %97 = vector.broadcast %c16_i32 : i32 to vector<24x128xi32>
    %98 = arith.cmpi slt, %96, %97 : vector<24x128xi32>
    %cst_38 = arith.constant 0.000000e+00 : f32
    %99 = vector.broadcast %cst_38 : f32 to vector<24x128xf32>
    %100 = arith.maximumf %95, %99 : vector<24x128xf32>
    %101 = vector.broadcast %cst_38 : f32 to vector<24x128xf32>
    %102 = arith.subf %95, %101 : vector<24x128xf32>
    %103 = arith.cmpf one, %102, %102 : vector<24x128xf32>
    %104 = vector.broadcast %cst_38 : f32 to vector<24x128xf32>
    %105 = arith.addf %95, %104 : vector<24x128xf32>
    %106 = math.absf %102 : vector<24x128xf32>
    %cst_39 = arith.constant 0.000000e+00 : f32
    %107 = vector.broadcast %cst_39 : f32 to vector<24x128xf32>
    %108 = arith.subf %107, %106 : vector<24x128xf32>
    %109 = math.exp %108 : vector<24x128xf32>
    %110 = math.log1p %109 : vector<24x128xf32>
    %111 = arith.addf %100, %110 : vector<24x128xf32>
    %112 = arith.select %103, %105, %111 : vector<24x128xi1>, vector<24x128xf32>
    %cst_40 = arith.constant 0.000000e+00 : f32
    %113 = vector.broadcast %cst_40 : f32 to vector<24x128xf32>
    %114 = arith.select %98, %112, %113 : vector<24x128xi1>, vector<24x128xf32>
    %115 = vector.shape_cast %114 : vector<24x128xf32> to vector<1x24x128xf32>
    %cst_41 = arith.constant dense<0.000000e+00> : vector<1xf32>
    %116 = vector.multi_reduction <add>, %115, %cst_41 [1, 2] : vector<1x24x128xf32> to vector<1xf32>
    %117 = vector.shape_cast %116 : vector<1xf32> to vector<1x1x1xf32>
    %118 = vector.extract %117[0, 0, 0] : f32 from vector<1x1x1xf32>
    %119 = vector.broadcast %118 : f32 to vector<1x1xf32>
    %120 = vector.shape_cast %95 : vector<24x128xf32> to vector<3x8x128xf32>
    %cst_42 = arith.constant dense<0.000000e+00> : vector<8x128xf32>
    %121 = vector.multi_reduction <add>, %120, %cst_42 [0] : vector<3x8x128xf32> to vector<8x128xf32>
    %122 = arith.mulf %0, %121 : vector<8x128xf32>
    %123 = vector.shape_cast %122 : vector<8x128xf32> to vector<1x8x128xf32>
    %cst_43 = arith.constant dense<0.000000e+00> : vector<1xf32>
    %124 = vector.multi_reduction <add>, %123, %cst_43 [1, 2] : vector<1x8x128xf32> to vector<1xf32>
    %125 = vector.shape_cast %124 : vector<1xf32> to vector<1x1x1xf32>
    %126 = vector.extract %125[0, 0, 0] : f32 from vector<1x1x1xf32>
    %127 = vector.broadcast %126 : f32 to vector<1x1xf32>
    %128 = arith.subf %119, %127 : vector<1x1xf32>
    %cst_44 = arith.constant 0.333333343 : f32
    %129 = vector.broadcast %cst_44 : f32 to vector<1x1xf32>
    %130 = arith.mulf %128, %129 : vector<1x1xf32>
    %131 = arith.addf %65, %130 : vector<1x1xf32>
    %132 = vector.extract_strided_slice %72 {offsets = [2, 0, 0], sizes = [1, 8, 128], strides = [1, 1, 1]} : vector<3x8x128xf32> to vector<1x8x128xf32>
    %133 = vector.shape_cast %132 : vector<1x8x128xf32> to vector<8x128xf32>
    %c0_45 = arith.constant 0 : index
    %c0_46 = arith.constant 0 : index
    %134 = vector.load %arg3[%c0_45, %c0_46] : memref<24x128xf32, #tpu.memory_space<vmem>>, vector<8x128xf32>
    tpu.vector_store %arg3[%c0_45, %c0_46], %133 {strides = array<i32>} : memref<24x128xf32, #tpu.memory_space<vmem>>, vector<8x128xf32>,
    %135 = vector.extract_strided_slice %120 {offsets = [2, 0, 0], sizes = [1, 8, 128], strides = [1, 1, 1]} : vector<3x8x128xf32> to vector<1x8x128xf32>
    %136 = vector.shape_cast %135 : vector<1x8x128xf32> to vector<8x128xf32>
    %137 = arith.negf %136 : vector<8x128xf32>
    %138 = math.exp %137 : vector<8x128xf32>
    %cst_47 = arith.constant 1.000000e+00 : f32
    %139 = vector.broadcast %cst_47 : f32 to vector<8x128xf32>
    %140 = arith.addf %139, %138 : vector<8x128xf32>
    %141 = arith.divf %139, %140 : vector<8x128xf32>
    %c8_48 = arith.constant 8 : index
    %c0_49 = arith.constant 0 : index
    %142 = vector.load %arg3[%c8_48, %c0_49] : memref<24x128xf32, #tpu.memory_space<vmem>>, vector<8x128xf32>
    tpu.vector_store %arg3[%c8_48, %c0_49], %141 {strides = array<i32>} : memref<24x128xf32, #tpu.memory_space<vmem>>, vector<8x128xf32>,
    %143 = tpu.iota {dimensions = array<i32: 1>} : vector<8x128xi32>
    %c0_i32 = arith.constant 0 : i32
    %144 = vector.broadcast %c0_i32 : i32 to vector<8x128xi32>
    %145 = arith.cmpi eq, %143, %144 : vector<8x128xi32>
    %c1_i32 = arith.constant 1 : i32
    %146 = vector.broadcast %c1_i32 : i32 to vector<8x128xi32>
    %147 = arith.cmpi eq, %143, %146 : vector<8x128xi32>
    %c2_i32 = arith.constant 2 : i32
    %148 = vector.broadcast %c2_i32 : i32 to vector<8x128xi32>
    %149 = arith.cmpi eq, %143, %148 : vector<8x128xi32>
    %cst_50 = arith.constant 0.000000e+00 : f32
    %150 = vector.shape_cast %130 : vector<1x1xf32> to vector<1x1xf32>
    %151 = vector.broadcast %150 : vector<1x1xf32> to vector<8x128xf32>
    %152 = vector.broadcast %cst_50 : f32 to vector<8x128xf32>
    %153 = arith.select %149, %151, %152 : vector<8x128xi1>, vector<8x128xf32>
    %154 = vector.shape_cast %65 : vector<1x1xf32> to vector<1x1xf32>
    %155 = vector.broadcast %154 : vector<1x1xf32> to vector<8x128xf32>
    %156 = arith.select %147, %155, %153 : vector<8x128xi1>, vector<8x128xf32>
    %157 = vector.shape_cast %131 : vector<1x1xf32> to vector<1x1xf32>
    %158 = vector.broadcast %157 : vector<1x1xf32> to vector<8x128xf32>
    %159 = arith.select %145, %158, %156 : vector<8x128xi1>, vector<8x128xf32>
    %c16 = arith.constant 16 : index
    %c0_51 = arith.constant 0 : index
    %160 = vector.load %arg3[%c16, %c0_51] : memref<24x128xf32, #tpu.memory_space<vmem>>, vector<8x128xf32>
    tpu.vector_store %arg3[%c16, %c0_51], %159 {strides = array<i32>} : memref<24x128xf32, #tpu.memory_space<vmem>>, vector<8x128xf32>,
    return
  }
}

</mosaic_0001>

<bundles_post_ra>
// kernel: vae_forward.1
= control target key start
LH: loop header
LB: loop body
LE: loop exit
PB: predicated region body
PF: predicated region fallthrough
CT: control target
= control target key end

     0   :  { %v1233_v0 = vmov 0.0   ;;  %vm1234_vm0 = vmmov 0   ;;  %v1235_v43 = vmov 0   ;;  %v264_v60 = vlaneseq  ;;  %s1492_s1 = inlined_call_operand.vmem [shape: bf16[128,896], index: 1, kind: input, shape index: {}]   ;;  %s1493_s0 = inlined_call_operand.vmem [shape: f32[32,128], index: 0, kind: input, shape index: {}]   ;;  %s1494_s2 = inlined_call_operand.vmem [shape: f32[1,896], index: 2, kind: input, shape index: {}]   ;;  %s1495_s3 = inlined_call_operand.vmem [shape: f32[24,128], index: 3, kind: output, shape index: {}]  }
   0x1   :  { %1034 = vmatprep.subr.bf16.mxu0 %v1233_v0  ;;  %v1143_v1 = vld [vmem:[%s1492_s1 + $0x188] ss:$28 sps:$4 sm:$0xff]   ;;  %1050 = vmatprep.mubr.msk.bf16.mxu0 %vm1234_vm0, %v1233_v0  ;;  %v1144_v2 = vld [vmem:[%s1492_s1 + $0x150] ss:$28 sps:$4 sm:$0xff]   ;;  %v1145_v3 = vld [vmem:[%s1492_s1 + $0x118] ss:$28 sps:$4 sm:$0xff]  }
   0x2   :  { %1054 = vmatprep.subr.bf16.mxu1 %v1233_v0  ;;  %1070 = vmatprep.mubr.msk.bf16.mxu1 %vm1234_vm0, %v1233_v0  ;;  %v1151_v4 = vld [vmem:[%s1492_s1 + $0x18c] ss:$28 sps:$4 sm:$0xff]   ;;  %v1146_v5 = vld [vmem:[%s1492_s1 + $0xe0] ss:$28 sps:$4 sm:$0xff]   ;;  %v1152_v6 = vld [vmem:[%s1492_s1 + $0x154] ss:$28 sps:$4 sm:$0xff]  }
   0x3   :  { %1035 = vmatpush3.bf16.msra.mxu0 %v1143_v1  ;;  %1055 = vmatpush3.bf16.msra.mxu1 %v1151_v4  ;;  %v1147_v7 = vld [vmem:[%s1492_s1 + $0xa8] ss:$28 sps:$4 sm:$0xff]   ;;  %v1153_v8 = vld [vmem:[%s1492_s1 + $0x11c] ss:$28 sps:$4 sm:$0xff]   ;;  %v1148_v9 = vld [vmem:[%s1492_s1 + $0x70] ss:$28 sps:$4 sm:$0xff]  }
   0x4   :  { %1036 = vmatprep.subr.bf16.mxu0 %v1233_v0  ;;  %1056 = vmatprep.subr.bf16.mxu1 %v1233_v0  ;;  %v1154_v10 = vld [vmem:[%s1492_s1 + $0xe4] ss:$28 sps:$4 sm:$0xff]   ;;  %v1149_v11 = vld [vmem:[%s1492_s1 + $0x38] ss:$28 sps:$4 sm:$0xff]   ;;  %v1155_v12 = vld [vmem:[%s1492_s1 + $0xac] ss:$28 sps:$4 sm:$0xff]  }
   0x5   :  { %v1150_v13 = vld [vmem:[%s1492_s1] ss:$28 sps:$4 sm:$0xff]   ;;  %v1156_v15 = vld [vmem:[%s1492_s1 + $0x74] ss:$28 sps:$4 sm:$0xff]   ;;  %v1170_v25 = vld [vmem:[%s1492_s1 + $0xec] ss:$28 sps:$4 sm:$0xff]  }
   0x6   :  { %v1298_v14 = vld [vmem:[%s1493_s0] sm:$0xff]  ;;  %v1157_v17 = vld [vmem:[%s1492_s1 + $0x3c] ss:$28 sps:$4 sm:$0xff]   ;;  %v1159_v19 = vld [vmem:[%s1492_s1 + $0x190] ss:$28 sps:$4 sm:$0xff]   ;;  %v265_v61 = vshrl.u32 %v264_v60, 7 }
   0x7   :  { %1037 = vmatpush3.bf16.msra.mxu0 %v1144_v2  ;;  %1057 = vmatpush3.bf16.msra.mxu1 %v1152_v6  ;;  %v36_v16 = vpack.c.bf16 %v1298_v14, %v1298_v14  ;;  %v1158_v18 = vld [vmem:[%s1492_s1 + $0x4] ss:$28 sps:$4 sm:$0xff]   ;;  %v1161_v20 = vld [vmem:[%s1492_s1 + $0x194] ss:$28 sps:$4 sm:$0xff]   ;;  %v1164_v21 = vld [vmem:[%s1492_s1 + $0x15c] ss:$28 sps:$4 sm:$0xff]  }
   0x8   :  { %1038 = vmatprep.subr.bf16.mxu0 %v1233_v0  ;;  %1058 = vmatprep.subr.bf16.mxu1 %v1233_v0  ;;  %v1162_v22 = vld [vmem:[%s1492_s1 + $0x158] ss:$28 sps:$4 sm:$0xff]   ;;  %v1167_v23 = vld [vmem:[%s1492_s1 + $0x124] ss:$28 sps:$4 sm:$0xff]   ;;  %v1171_v28 = vld [vmem:[%s1492_s1 + $0xb0] ss:$28 sps:$4 sm:$0xff]  }
   0x9   :  { %v1165_v24 = vld [vmem:[%s1492_s1 + $0x120] ss:$28 sps:$4 sm:$0xff]   ;;  %v1168_v26 = vld [vmem:[%s1492_s1 + $0xe8] ss:$28 sps:$4 sm:$0xff]   ;;  %v1173_v27 = vld [vmem:[%s1492_s1 + $0xb4] ss:$28 sps:$4 sm:$0xff]  }
   0xa   :  { %v1176_v29 = vld [vmem:[%s1492_s1 + $0x7c] ss:$28 sps:$4 sm:$0xff]   ;;  %v1179_v31 = vld [vmem:[%s1492_s1 + $0x44] ss:$28 sps:$4 sm:$0xff]   ;;  %v1182_v41 = vld [vmem:[%s1492_s1 + $0xc] ss:$28 sps:$4 sm:$0xff]  }
   0xb   :  { %1039 = vmatpush3.bf16.msra.mxu0 %v1145_v3  ;;  %1059 = vmatpush3.bf16.msra.mxu1 %v1153_v8  ;;  %v1174_v30 = vld [vmem:[%s1492_s1 + $0x78] ss:$28 sps:$4 sm:$0xff]   ;;  %v1177_v32 = vld [vmem:[%s1492_s1 + $0x40] ss:$28 sps:$4 sm:$0xff]   ;;  %v1180_v42 = vld [vmem:[%s1492_s1 + $0x8] ss:$28 sps:$4 sm:$0xff]  }
   0xc   :  { %1040 = vmatprep.subr.bf16.mxu0 %v1233_v0  ;;  %1060 = vmatprep.subr.bf16.mxu1 %v1233_v0  ;;  %v922_v33 = vld [vmem:[%s1494_s2] ss:$0 sm:$0xff]  ;;  %v931_v44 = vld [vmem:[%s1494_s2 + $0x1] ss:$0 sm:$0xff]  ;;  %v1183_v52 = vld [vmem:[%s1492_s1 + $0x198] ss:$28 sps:$4 sm:$0xff]  }
   0xd   :  { %v1184_v53 = vld [vmem:[%s1492_s1 + $0x160] ss:$28 sps:$4 sm:$0xff]   ;;  %v1185_v54 = vld [vmem:[%s1492_s1 + $0x128] ss:$28 sps:$4 sm:$0xff]   ;;  %v1186_v55 = vld [vmem:[%s1492_s1 + $0xf0] ss:$28 sps:$4 sm:$0xff]  }
   0xe   :  { %v1187_v56 = vld [vmem:[%s1492_s1 + $0xb8] ss:$28 sps:$4 sm:$0xff]   ;;  %v1188_v57 = vld [vmem:[%s1492_s1 + $0x80] ss:$28 sps:$4 sm:$0xff]   ;;  %v1189_v58 = vld [vmem:[%s1492_s1 + $0x48] ss:$28 sps:$4 sm:$0xff]  }
   0xf   :  { %1041 = vmatpush3.bf16.msra.mxu0 %v1146_v5  ;;  %1061 = vmatpush3.bf16.msra.mxu1 %v1154_v10  ;;  %v1190_v59 = vld [vmem:[%s1492_s1 + $0x10] ss:$28 sps:$4 sm:$0xff]   ;;  %v270_v62 = vsub.s32 1, %v265_v61  ;;  %v261_v63 = vld [vmem:[%s1494_s2 + $0x2] sm:$0x3] }
  0x10   :  { %1042 = vmatprep.subr.bf16.mxu0 %v1233_v0  ;;  %1062 = vmatprep.subr.bf16.mxu1 %v1233_v0 }
  0x11   :  { %v271_v1 = vrot.slane %v261_v63, %v270_v62  ;;  %v1203_v62 = vld [vmem:[%s1492_s1 + $0xc0] ss:$28 sps:$4 sm:$0xff]  }
  0x13   :  { %1043 = vmatpush3.bf16.msra.mxu0 %v1147_v7  ;;  %1063 = vmatpush3.bf16.msra.mxu1 %v1155_v12 }
  0x14   :  { %1044 = vmatprep.subr.bf16.mxu0 %v1233_v0  ;;  %1064 = vmatprep.subr.bf16.mxu1 %v1233_v0 }
  0x17   :  { %1045 = vmatpush3.bf16.msra.mxu0 %v1148_v9  ;;  %1065 = vmatpush3.bf16.msra.mxu1 %v1156_v15 }
  0x18   :  { %1046 = vmatprep.subr.bf16.mxu0 %v1233_v0  ;;  %1066 = vmatprep.subr.bf16.mxu1 %v1233_v0 }
  0x1b   :  { %1047 = vmatpush3.bf16.msra.mxu0 %v1149_v11  ;;  %1067 = vmatpush3.bf16.msra.mxu1 %v1157_v17 }
  0x1c   :  { %1048 = vmatprep.subr.bf16.mxu0 %v1233_v0  ;;  %1068 = vmatprep.subr.bf16.mxu1 %v1233_v0  ;;  %v266_v0 = vsub.s32 0, %v265_v61  ;;  %v1202_v61 = vld [vmem:[%s1492_s1 + $0xf8] ss:$28 sps:$4 sm:$0xff]  }
  0x1e   :  { %v267_v4 = vrot.slane %v261_v63, %v266_v0 }
  0x1f   :  { %1049 = vmatpush3.bf16.msra.mxu0 %v1150_v13  ;;  %1069 = vmatpush3.bf16.msra.mxu1 %v1158_v18 }
  0x20   :  { %354 = vmatprep.subr.bf16.mxu0 %v1161_v20  ;;  %1074 = vmatprep.subr.bf16.mxu1 %v1183_v52 }
  0x22   :  { %1051 = vmatmul.mubr.bf16.vlgmr.msra.gmra.mxu0 %v36_v16 }
  0x23   :  { %355 = vmatpush1.bf16.msra.mxu0 %v1159_v19  ;;  %386 = vmatprep.mubr.bf16.mxu0 %v1235_v43 }
  0x24   :  { %356 = vmatprep.subr.bf16.mxu0 %v1164_v21 }
  0x27   :  { %357 = vmatpush1.bf16.msra.mxu0 %v1162_v22 }
  0x28   :  { %358 = vmatprep.subr.bf16.mxu0 %v1167_v23 }
  0x2b   :  { %359 = vmatpush1.bf16.msra.mxu0 %v1165_v24 }
  0x2c   :  { %360 = vmatprep.subr.bf16.mxu0 %v1170_v25 }
  0x2f   :  { %361 = vmatpush1.bf16.msra.mxu0 %v1168_v26 }
  0x30   :  { %362 = vmatprep.subr.bf16.mxu0 %v1173_v27  ;;  %v16_v27 = vld [vmem:[%s1493_s0 + $0x8] sm:$0xff] }
  0x33   :  { %363 = vmatpush1.bf16.msra.mxu0 %v1171_v28  ;;  %v17_v28 = vld [vmem:[%s1493_s0 + $0x10] sm:$0xff] }
  0x34   :  { %364 = vmatprep.subr.bf16.mxu0 %v1176_v29  ;;  %v18_v29 = vld [vmem:[%s1493_s0 + $0x18] sm:$0xff] }
  0x37   :  { %365 = vmatpush1.bf16.msra.mxu0 %v1174_v30 }
  0x38   :  { %366 = vmatprep.subr.bf16.mxu0 %v1179_v31 }
  0x3b   :  { %367 = vmatpush1.bf16.msra.mxu0 %v1177_v32 }
  0x3c   :  { %368 = vmatprep.subr.bf16.mxu0 %v1182_v41 }
  0x3f   :  { %369 = vmatpush1.bf16.msra.mxu0 %v1180_v42 }
  0xe2   :  { %v125_v34 = vpop.f32.mrf.mxu0 }
  0xe3   :  { %v126_v35 = vadd.f32 %v922_v33, %v125_v34 }
  0xe4   :  { %v1052_v36 = vpop.f32.mrf.mxu0 }
  0xe5   :  { %v131_v37 = vmax.f32 %v126_v35, 0.0 }
  0xe6   :  { %v128_v38 = vpop.f32.mrf.mxu0 }
  0xe7   :  { %v149_v39 = vpack.c.bf16 %v131_v37, %v131_v37 }
  0xe8   :  { %v1053_v40 = vpop.f32.mrf.mxu0 }
  0xe9   :  { %1071 = vmatmul.mubr.bf16.vlgmr.msra.gmra.mxu1 %v149_v39 }
  0xea   :  { %1075 = vmatpush3.bf16.msra.mxu1 %v1183_v52  ;;  %v1193_v52 = vld [vmem:[%s1492_s1 + $0x12c] ss:$28 sps:$4 sm:$0xff]  }
  0xeb   :  { %1076 = vmatprep.subr.bf16.mxu1 %v1184_v53 }
  0xee   :  { %1077 = vmatpush3.bf16.msra.mxu1 %v1184_v53  ;;  %v1194_v53 = vld [vmem:[%s1492_s1 + $0xf4] ss:$28 sps:$4 sm:$0xff]  }
  0xef   :  { %1078 = vmatprep.subr.bf16.mxu1 %v1185_v54 }
  0xf2   :  { %1079 = vmatpush3.bf16.msra.mxu1 %v1185_v54  ;;  %v1195_v54 = vld [vmem:[%s1492_s1 + $0xbc] ss:$28 sps:$4 sm:$0xff]  }
  0xf3   :  { %1080 = vmatprep.subr.bf16.mxu1 %v1186_v55 }
  0xf6   :  { %1081 = vmatpush3.bf16.msra.mxu1 %v1186_v55  ;;  %v1196_v55 = vld [vmem:[%s1492_s1 + $0x84] ss:$28 sps:$4 sm:$0xff]  }
  0xf7   :  { %1082 = vmatprep.subr.bf16.mxu1 %v1187_v56 }
  0xfa   :  { %1083 = vmatpush3.bf16.msra.mxu1 %v1187_v56  ;;  %v1197_v56 = vld [vmem:[%s1492_s1 + $0x4c] ss:$28 sps:$4 sm:$0xff]  }
  0xfb   :  { %1084 = vmatprep.subr.bf16.mxu1 %v1188_v57 }
  0xfe   :  { %1085 = vmatpush3.bf16.msra.mxu1 %v1188_v57  ;;  %v1198_v57 = vld [vmem:[%s1492_s1 + $0x14] ss:$28 sps:$4 sm:$0xff]  }
  0xff   :  { %1086 = vmatprep.subr.bf16.mxu1 %v1189_v58 }
 0x102   :  { %1087 = vmatpush3.bf16.msra.mxu1 %v1189_v58  ;;  %v1199_v58 = vld [vmem:[%s1492_s1 + $0x1a0] ss:$28 sps:$4 sm:$0xff]  }
 0x103   :  { %1088 = vmatprep.subr.bf16.mxu1 %v1190_v59 }
 0x106   :  { %1089 = vmatpush3.bf16.msra.mxu1 %v1190_v59  ;;  %v1200_v59 = vld [vmem:[%s1492_s1 + $0x168] ss:$28 sps:$4 sm:$0xff]  }
 0x107   :  { %1114 = vmatprep.subr.bf16.mxu1 %v1199_v58 }
 0x1a9   :  { %v238_v45 = vpop.f32.mrf.mxu1 }
 0x1aa   :  { %v239_v46 = vadd.f32 %v931_v44, %v238_v45  ;;  %v1404_v44 = vand.u32 127, %v264_v60  ;;  %v1201_v60 = vld [vmem:[%s1492_s1 + $0x130] ss:$28 sps:$4 sm:$0xff]  }
 0x1ab   :  { %v1072_v47 = vpop.f32.mrf.mxu1 }
 0x1ac   :  { %v244_v48 = vmax.f32 %v239_v46, 0.0  ;;  %vm429_vm3 = vcmp.lt.s32.totalorder %v1404_v44, 8  ;;  %vm817_vm10 = vcmp.lt.s32.totalorder %v1404_v44, 16  ;;  %vm913_vm11 = vcmp.eq.s32.totalorder %v1404_v44, 2 }
 0x1ad   :  { %v241_v49 = vpop.f32.mrf.mxu1  ;;  %vm912_vm12 = vcmp.eq.s32.totalorder %v1404_v44, 1  ;;  %vm911_vm13 = vcmp.eq.s32.totalorder %v1404_v44, 0 }
 0x1ae   :  { %v262_v50 = vpack.c.bf16 %v244_v48, %v244_v48 }
 0x1af   :  { %v1073_v51 = vpop.f32.mrf.mxu1 }
 0x1b0   :  { %387 = vmatmul.mubr.bf16.vlgmr.msra.gmra.mxu0 %v262_v50  ;;  %v1191_v50 = vld [vmem:[%s1492_s1 + $0x19c] ss:$28 sps:$4 sm:$0xff]   ;;  %v1192_v51 = vld [vmem:[%s1492_s1 + $0x164] ss:$28 sps:$4 sm:$0xff]  }
 0x1b1   :  { %1094 = vmatprep.subr.bf16.mxu0 %v1191_v50 }
 0x1b2   :  { %1095 = vmatpush3.bf16.msra.mxu0 %v1191_v50 }
 0x1b3   :  { %1096 = vmatprep.subr.bf16.mxu0 %v1192_v51 }
 0x1b6   :  { %1097 = vmatpush3.bf16.msra.mxu0 %v1192_v51 }
 0x1b7   :  { %1098 = vmatprep.subr.bf16.mxu0 %v1193_v52 }
 0x1ba   :  { %1099 = vmatpush3.bf16.msra.mxu0 %v1193_v52 }
 0x1bb   :  { %1100 = vmatprep.subr.bf16.mxu0 %v1194_v53 }
 0x1be   :  { %1101 = vmatpush3.bf16.msra.mxu0 %v1194_v53 }
 0x1bf   :  { %1102 = vmatprep.subr.bf16.mxu0 %v1195_v54 }
 0x1c2   :  { %1103 = vmatpush3.bf16.msra.mxu0 %v1195_v54 }
 0x1c3   :  { %1104 = vmatprep.subr.bf16.mxu0 %v1196_v55 }
 0x1c6   :  { %1105 = vmatpush3.bf16.msra.mxu0 %v1196_v55 }
 0x1c7   :  { %1106 = vmatprep.subr.bf16.mxu0 %v1197_v56 }
 0x1ca   :  { %1107 = vmatpush3.bf16.msra.mxu0 %v1197_v56 }
 0x1cb   :  { %1108 = vmatprep.subr.bf16.mxu0 %v1198_v57 }
 0x1ce   :  { %1109 = vmatpush3.bf16.msra.mxu0 %v1198_v57 }
 0x270   :  { %v388_v2 = vpop.f32.mrf.mxu0 }
 0x271   :  { %v389_v9 = vadd.f32 %v388_v2, %v267_v4 }
 0x272   :  { %v390_v3 = vpop.f32.mrf.mxu0 }
 0x273   :  { %v391_v5 = vadd.f32 %v390_v3, %v271_v1  ;;  %v956_v12 = vmul.f32 -1.442695, %v389_v9 }
 0x274   :  { %v392_v6 = vpop.f32.mrf.mxu0 }
 0x275   :  { %v404_v7 = vand.u32 2147483647, %v391_v5  ;;  %v401_v24 = vmax.f32 %v391_v5, 0.0  ;;  %vm402_vm2 = vcmp.ne.f32.partialorder %v391_v5, %v391_v5 }
 0x276   :  { %v393_v8 = vpop.f32.mrf.mxu0 }
 0x277   :  { %v405_v10 = vsub.f32 0.0, %v404_v7  ;;  %v958_v7 = vld [vmem:[%s1494_s2 + $0x4] ss:$0 sm:$0xff] }
 0x279   :  { %v406_v11 = vmul.f32 1.442695, %v405_v10 }
 0x27b   :  { %1207 = vpow2.f32 %v406_v11 }
 0x27c   :  { %1209 = vpow2.f32 %v956_v12 }
 0x288   :  { %v1208_v13 = vpop.eup %1207 }
 0x289   :  { %v408_v15 = vadd.f32 1.0, %v1208_v13  ;;  %v1210_v16 = vpop.eup %1209  ;;  %v411_v18 = vmul.f32 -0.5, %v1208_v13  ;;  %v414_v20 = vand.u32 2147483647, %v1208_v13 }
 0x28a   :  { %v398_v17 = vadd.f32 1.0, %v1210_v16 }
 0x28b   :  { %1211 = vlog2.f32 %v408_v15  ;;  %v412_v19 = vadd.f32 1.0, %v411_v18  ;;  %vm415_vm1 = vcmp.lt.f32.partialorder %v414_v20, 0.0004427343  ;;  %v1204_v20 = vld [vmem:[%s1492_s1 + $0x88] ss:$28 sps:$4 sm:$0xff]  }
 0x28c   :  { %1213 = vrcp.f32 %v398_v17 }
 0x28d   :  { %v413_v23 = vmul.f32 %v1208_v13, %v412_v19 }
 0x298   :  { %v1212_v21 = vpop.eup %1211 }
 0x299   :  { %v410_v22 = vmul.f32 0.6931472, %v1212_v21  ;;  %v1214_v34 = vpop.eup %1213  ;;  %v1205_v21 = vld [vmem:[%s1492_s1 + $0x50] ss:$28 sps:$4 sm:$0xff]  }
 0x29a   :  { %v426_v46 = vmul.f32 %v1214_v34, %v1214_v34 }
 0x29b   :  { %v416_v25 = vsel %vm415_vm1, %v413_v23, %v410_v22  ;;  %v1206_v22 = vld [vmem:[%s1492_s1 + $0x18] ss:$28 sps:$4 sm:$0xff]  }
 0x29c   :  { %v417_v26 = vadd.f32 %v416_v25, %v401_v24  ;;  %v967_v24 = vld [vmem:[%s1494_s2 + $0x5] ss:$0 sm:$0xff] }
 0x29e   :  { %v418_v30 = vsel %vm402_vm2, %v391_v5, %v417_v26 }
 0x29f   :  { %v442_v31 = vmul.f32 %v418_v30, %v16_v27  ;;  %v443_v32 = vmul.f32 %v418_v30, %v17_v28  ;;  %v444_v33 = vmul.f32 %v418_v30, %v18_v29  ;;  %1215 = vlog2.f32 %v418_v30 }
 0x2a0   :  { %v424_v43 = vmul.f32 %v418_v30, %v418_v30 }
 0x2a1   :  { %v445_v35 = vadd.f32 %v1214_v34, %v442_v31  ;;  %v446_v36 = vadd.f32 %v1214_v34, %v443_v32  ;;  %v447_v37 = vadd.f32 %v1214_v34, %v444_v33 }
 0x2a3   :  { %v465_v38 = vpack.c.bf16 %v446_v36, %v445_v35  ;;  %v466_v39 = vpack.c.bf16 %v447_v37, %v447_v37  ;;  %903 = vst [vmem:[%s1495_s3] sm:$0xff] %v447_v37  ;;  %v976_v36 = vld [vmem:[%s1494_s2 + $0x6] ss:$0 sm:$0xff] }
 0x2a5   :  { %1090 = vmatprep.mubr.bf16.mxu1 %v465_v38 }
 0x2a6   :  { %1091 = vmatmul.mubr.bf16.vlgmr.msra.gmra.mxu1 %v466_v39 }
 0x2a7   :  { %1115 = vmatpush3.bf16.msra.mxu1 %v1199_v58 }
 0x2a8   :  { %1116 = vmatprep.subr.bf16.mxu1 %v1200_v59 }
 0x2ab   :  { %1117 = vmatpush3.bf16.msra.mxu1 %v1200_v59 }
 0x2ac   :  { %v1216_v40 = vpop.eup %1215  ;;  %1118 = vmatprep.subr.bf16.mxu1 %v1201_v60 }
 0x2ad   :  { %v422_v41 = vmul.f32 0.6931472, %v1216_v40 }
 0x2af   :  { %v423_v42 = vmul.f32 -2.0, %v422_v41  ;;  %1119 = vmatpush3.bf16.msra.mxu1 %v1201_v60 }
 0x2b0   :  { %1120 = vmatprep.subr.bf16.mxu1 %v1202_v61 }
 0x2b1   :  { %v425_v45 = vadd.f32 %v424_v43, %v423_v42 }
 0x2b3   :  { %v427_v47 = vadd.f32 %v426_v46, %v425_v45  ;;  %1121 = vmatpush3.bf16.msra.mxu1 %v1202_v61 }
 0x2b4   :  { %1122 = vmatprep.subr.bf16.mxu1 %v1203_v62 }
 0x2b5   :  { %v957_v48 = vadd.f32 -1.0, %v427_v47 }
 0x2b7   :  { %v430_v49 = vsel %vm429_vm3, %v957_v48, 0.0  ;;  %1123 = vmatpush3.bf16.msra.mxu1 %v1203_v62 }
 0x2b8   :  { %431 = vadd.xlane.f32.xlu0 %v430_v49  ;;  %1124 = vmatprep.subr.bf16.mxu1 %v1204_v20 }
 0x2bb   :  { %1125 = vmatpush3.bf16.msra.mxu1 %v1204_v20 }
 0x2bc   :  { %1126 = vmatprep.subr.bf16.mxu1 %v1205_v21 }
 0x2bf   :  { %1127 = vmatpush3.bf16.msra.mxu1 %v1205_v21 }
 0x2c0   :  { %1128 = vmatprep.subr.bf16.mxu1 %v1206_v22 }
 0x2c3   :  { %1129 = vmatpush3.bf16.msra.mxu1 %v1206_v22 }
 0x341   :  { %v432_v63 = vpop.xlane.xlu0 %431 }
 0x342   :  { %v433_v0 = vrot.slane %v432_v63, 4 }
 0x344   :  { %v434_v1 = vadd.f32 %v433_v0, %v432_v63 }
 0x346   :  { %v435_v2 = vrot.slane %v434_v1, 2 }
 0x348   :  { %v436_v3 = vadd.f32 %v435_v2, %v434_v1 }
 0x34a   :  { %v437_v4 = vrot.slane %v436_v3, 1 }
 0x34c   :  { %v438_v5 = vadd.f32 %v437_v4, %v436_v3 }
 0x34e   :  { %1134 = vpush %v438_v5 }
 0x366   :  { %v1092_v6 = vpop.f32.mrf.mxu1 }
 0x367   :  { %v564_v9 = vadd.f32 %v1092_v6, %v958_v7 }
 0x368   :  { %v555_v8 = vpop.f32.mrf.mxu1 }
 0x369   :  { %v556_v11 = vadd.f32 %v958_v7, %v555_v8  ;;  %v571_v15 = vmax.f32 %v564_v9, 0.0 }
 0x36a   :  { %v1093_v10 = vpop.f32.mrf.mxu1 }
 0x36b   :  { %v569_v16 = vmax.f32 %v556_v11, 0.0  ;;  %v590_v19 = vpack.c.bf16 %v571_v15, %v571_v15 }
 0x36c   :  { %v558_v12 = vpop.f32.mrf.mxu1 }
 0x36d   :  { %v559_v13 = vadd.f32 %v958_v7, %v558_v12 }
 0x36f   :  { %v570_v17 = vmax.f32 %v559_v13, 0.0 }
 0x371   :  { %v589_v18 = vpack.c.bf16 %v570_v17, %v569_v16 }
 0x373   :  { %1110 = vmatprep.mubr.bf16.mxu0 %v589_v18 }
 0x374   :  { %1111 = vmatmul.mubr.bf16.vlgmr.msra.gmra.mxu0 %v590_v19 }
 0x37f   :  { %s1135_s9 = spop %1134 }
 0x434   :  { %v1112_v23 = vpop.f32.mrf.mxu0 }
 0x435   :  { %v688_v26 = vadd.f32 %v1112_v23, %v967_v24 }
 0x436   :  { %v679_v25 = vpop.f32.mrf.mxu0 }
 0x437   :  { %v680_v28 = vadd.f32 %v967_v24, %v679_v25  ;;  %v695_v31 = vmax.f32 %v688_v26, 0.0 }
 0x438   :  { %v1113_v27 = vpop.f32.mrf.mxu0 }
 0x439   :  { %v693_v32 = vmax.f32 %v680_v28, 0.0  ;;  %v714_v35 = vpack.c.bf16 %v695_v31, %v695_v31 }
 0x43a   :  { %v682_v29 = vpop.f32.mrf.mxu0 }
 0x43b   :  { %v683_v30 = vadd.f32 %v967_v24, %v682_v29 }
 0x43d   :  { %v694_v33 = vmax.f32 %v683_v30, 0.0 }
 0x43f   :  { %v713_v34 = vpack.c.bf16 %v694_v33, %v693_v32 }
 0x441   :  { %1130 = vmatprep.mubr.bf16.mxu1 %v713_v34 }
 0x442   :  { %1131 = vmatmul.mubr.bf16.vlgmr.msra.gmra.mxu1 %v714_v35 }
 0x502   :  { %v1132_v37 = vpop.f32.mrf.mxu1 }
 0x503   :  { %v1464_v38 = vadd.f32 %v1132_v37, %v976_v36 }
 0x504   :  { %v803_v39 = vpop.f32.mrf.mxu1 }
 0x505   :  { %v829_v40 = vand.u32 2147483647, %v1464_v38  ;;  %v985_v41 = vmul.f32 -1.442695, %v1464_v38  ;;  %v1468_v42 = vadd.f32 %v976_v36, %v803_v39  ;;  %v820_v22 = vmax.f32 %v1464_v38, 0.0 }
 0x506   :  { %v1133_v43 = vpop.f32.mrf.mxu1  ;;  %vm823_vm9 = vcmp.ne.f32.partialorder %v1464_v38, %v1464_v38 }
 0x507   :  { %v832_v45 = vsub.f32 0.0, %v829_v40  ;;  %1217 = vpow2.f32 %v985_v41  ;;  %v827_v46 = vand.u32 2147483647, %v1468_v42  ;;  %v818_v12 = vmax.f32 %v1468_v42, 0.0 }
 0x508   :  { %v806_v47 = vpop.f32.mrf.mxu1  ;;  %vm821_vm7 = vcmp.ne.f32.partialorder %v1468_v42, %v1468_v42 }
 0x509   :  { %v837_v48 = vmul.f32 1.442695, %v832_v45  ;;  %v830_v49 = vsub.f32 0.0, %v827_v46  ;;  %v807_v50 = vadd.f32 %v976_v36, %v806_v47 }
 0x50b   :  { %1219 = vpow2.f32 %v837_v48  ;;  %v833_v51 = vmul.f32 1.442695, %v830_v49  ;;  %v828_v52 = vand.u32 2147483647, %v807_v50  ;;  %v887_v53 = vadd.f32 %v807_v50, %v1468_v42 }
 0x50c   :  { %v819_v26 = vmax.f32 %v807_v50, 0.0  ;;  %vm822_vm8 = vcmp.ne.f32.partialorder %v807_v50, %v807_v50 }
 0x50d   :  { %1221 = vpow2.f32 %v833_v51  ;;  %v831_v54 = vsub.f32 0.0, %v828_v52  ;;  %v888_v55 = vadd.f32 %v887_v53, %v1464_v38 }
 0x50f   :  { %v835_v56 = vmul.f32 1.442695, %v831_v54  ;;  %v889_v57 = vmul.f32 %v888_v55, %v1298_v14  ;;  %v440_v54 = vstv %s1135_s9 }
 0x511   :  { %1223 = vpow2.f32 %v835_v56  ;;  %890 = vadd.xlane.f32.xlu1 %v889_v57  ;;  %v441_v57 = vmul.f32 0.5, %v440_v54 }
 0x514   :  { %v1218_v58 = vpop.eup %1217 }
 0x515   :  { %v907_v59 = vadd.f32 1.0, %v1218_v58 }
 0x517   :  { %1225 = vrcp.f32 %v907_v59 }
 0x518   :  { %v1220_v60 = vpop.eup %1219 }
 0x519   :  { %v857_v61 = vadd.f32 1.0, %v1220_v60  ;;  %v860_v3 = vmul.f32 -0.5, %v1220_v60  ;;  %v863_v9 = vand.u32 2147483647, %v1220_v60 }
 0x51a   :  { %v1222_v62 = vpop.eup %1221 }
 0x51b   :  { %v839_v63 = vadd.f32 1.0, %v1222_v62  ;;  %1227 = vlog2.f32 %v857_v61  ;;  %v842_v2 = vmul.f32 -0.5, %v1222_v62  ;;  %v861_v6 = vadd.f32 1.0, %v860_v3 }
 0x51c   :  { %v845_v8 = vand.u32 2147483647, %v1222_v62  ;;  %vm864_vm5 = vcmp.lt.f32.partialorder %v863_v9, 0.0004427343 }
 0x51d   :  { %1229 = vlog2.f32 %v839_v63  ;;  %v843_v14 = vadd.f32 1.0, %v842_v2  ;;  %v862_v17 = vmul.f32 %v1220_v60, %v861_v6 }
 0x51e   :  { %v1224_v0 = vpop.eup %1223  ;;  %vm846_vm4 = vcmp.lt.f32.partialorder %v845_v8, 0.0004427343 }
 0x51f   :  { %v848_v1 = vadd.f32 1.0, %v1224_v0  ;;  %v851_v5 = vmul.f32 -0.5, %v1224_v0  ;;  %v844_v15 = vmul.f32 %v1222_v62, %v843_v14  ;;  %v854_v18 = vand.u32 2147483647, %v1224_v0 }
 0x521   :  { %1231 = vlog2.f32 %v848_v1  ;;  %v852_v16 = vadd.f32 1.0, %v851_v5  ;;  %vm855_vm6 = vcmp.lt.f32.partialorder %v854_v18, 0.0004427343 }
 0x523   :  { %v853_v25 = vmul.f32 %v1224_v0, %v852_v16 }
 0x524   :  { %v1226_v4 = vpop.eup %1225 }
 0x525   :  { %910 = vst [vmem:[%s1495_s3 + $0x8] sm:$0xff] %v1226_v4 }
 0x528   :  { %v1228_v7 = vpop.eup %1227 }
 0x529   :  { %v859_v10 = vmul.f32 0.6931472, %v1228_v7 }
 0x52a   :  { %v1230_v11 = vpop.eup %1229 }
 0x52b   :  { %v841_v13 = vmul.f32 0.6931472, %v1230_v11  ;;  %v865_v20 = vsel %vm864_vm5, %v862_v17, %v859_v10 }
 0x52c   :  { %v868_v27 = vadd.f32 %v865_v20, %v820_v22 }
 0x52d   :  { %v847_v19 = vsel %vm846_vm4, %v844_v15, %v841_v13 }
 0x52e   :  { %v1232_v21 = vpop.eup %1231  ;;  %v866_v23 = vadd.f32 %v847_v19, %v818_v12  ;;  %v871_v32 = vsel %vm823_vm9, %v1464_v38, %v868_v27 }
 0x52f   :  { %v850_v24 = vmul.f32 0.6931472, %v1232_v21  ;;  %v874_v36 = vsel %vm817_vm10, %v871_v32, 0.0 }
 0x530   :  { %v869_v30 = vsel %vm821_vm7, %v1468_v42, %v866_v23 }
 0x531   :  { %v856_v28 = vsel %vm855_vm6, %v853_v25, %v850_v24  ;;  %v872_v33 = vsel %vm817_vm10, %v869_v30, 0.0 }
 0x532   :  { %v867_v29 = vadd.f32 %v856_v28, %v819_v26 }
 0x534   :  { %v870_v31 = vsel %vm822_vm8, %v807_v50, %v867_v29 }
 0x535   :  { %v873_v34 = vsel %vm817_vm10, %v870_v31, 0.0 }
 0x536   :  { %v875_v35 = vadd.f32 %v873_v34, %v872_v33 }
 0x538   :  { %v876_v37 = vadd.f32 %v875_v35, %v874_v36 }
 0x53a   :  { %877 = vadd.xlane.f32.xlu0 %v876_v37 }
 0x59a   :  { %v891_v39 = vpop.xlane.xlu1 %890 }
 0x59b   :  { %v892_v40 = vrot.slane %v891_v39, 4 }
 0x59d   :  { %v893_v41 = vadd.f32 %v892_v40, %v891_v39 }
 0x59f   :  { %v894_v43 = vrot.slane %v893_v41, 2 }
 0x5a1   :  { %v895_v47 = vadd.f32 %v894_v43, %v893_v41 }
 0x5a3   :  { %v896_v51 = vrot.slane %v895_v47, 1 }
 0x5a5   :  { %v897_v38 = vadd.f32 %v896_v51, %v895_v47 }
 0x5c3   :  { %v878_v42 = vpop.xlane.xlu0 %877 }
 0x5c4   :  { %v879_v45 = vrot.slane %v878_v42, 4 }
 0x5c6   :  { %v880_v46 = vadd.f32 %v879_v45, %v878_v42 }
 0x5c8   :  { %v881_v48 = vrot.slane %v880_v46, 2 }
 0x5ca   :  { %v882_v49 = vadd.f32 %v881_v48, %v880_v46 }
 0x5cc   :  { %v883_v50 = vrot.slane %v882_v49, 1 }
 0x5ce   :  { %v884_v52 = vadd.f32 %v883_v50, %v882_v49 }
 0x5d0   :  { %1136 = vpush %v884_v52 }
 0x5d1   :  { %1138 = vpush %v897_v38 }
 0x601   :  { %s1137_s10 = spop %1136 }
 0x602   :  { %v886_v53 = vstv %s1137_s10  ;;  %s1139_s11 = spop %1138 }
 0x603   :  { %v899_v55 = vstv %s1139_s11 }
 0x604   :  { %v900_v56 = vsub.f32 %v886_v53, %v899_v55 }
 0x606   :  { %v901_v58 = vmul.f32 0.33333334, %v900_v56 }
 0x608   :  { %v902_v59 = vadd.f32 %v901_v58, %v441_v57  ;;  %v914_v60 = vsel %vm913_vm11, %v901_v58, 0.0 }
 0x609   :  { %v915_v61 = vsel %vm912_vm12, %v441_v57, %v914_v60 }
 0x60a   :  { %v916_v62 = vsel %vm911_vm13, %v902_v59, %v915_v61 }
 0x60b   :  { %917 = vst [vmem:[%s1495_s3 + $0x10] sm:$0xff] %v916_v62 }

</bundles_post_ra>
